<compile_context>
chip_gen: v7x
topology: tpu7x:2x2x1
jax: 0.10.0
libtpu: 0.0.40
codegen_flags: <defaults>
</compile_context>

<pallas_src>
import jax
import jax.numpy as jnp
from jax.experimental import pallas as pl
from jax.experimental.pallas import tpu as pltpu


DEFAULT_BLOCK_B = 4096   # batch tile (rows per grid step); weights stay resident


def _round_up(x, m):
    return (x + m - 1) // m * m


def _choose_batch_tile(B, block_b):
    """Pick the batch tile: big tiles to amortize per-step overhead, but
    guarantee >=2 grid steps for moderate B so v7x's 2nd TensorCore is used."""
    if B <= 8:
        return B                        # single full block (equals full dim)
    tb = min(block_b, _round_up(pl.cdiv(B, 2), 8))
    if tb >= B:                         # safety: fall back to one full block
        tb = B
    return tb


def _make_concat_head_kernel(n_modalities):
    """Fused concat -> fc1 -> ReLU -> (dropout=identity) -> fc_action kernel."""

    def kernel(*refs):
        xs = refs[:n_modalities]                       # per-modality activations
        w1s = refs[n_modalities:2 * n_modalities]      # per-modality fc1 slices (bf16)
        b1_ref, w2_ref, b2_ref, o_ref = refs[2 * n_modalities:]

        # fc1 as split-K over the modality slices: equivalent to
        # dot(concat(xs, axis=1), w1). bf16 MXU operands, f32 accumulation.
        h = jnp.dot(xs[0][...].astype(jnp.bfloat16), w1s[0][...],
                    preferred_element_type=jnp.float32)
        for x_ref, w_ref in zip(xs[1:], w1s[1:]):
            h = h + jnp.dot(x_ref[...].astype(jnp.bfloat16), w_ref[...],
                            preferred_element_type=jnp.float32)

        # bias + ReLU in f32 on the VPU (keeps v5e's no-bf16 VPU happy).
        h = jnp.maximum(h + b1_ref[...], 0.0)

        # TODO(synk): nn.Dropout is identity in eval mode; training-mode dropout
        # (random mask + 1/(1-p) scaling) is not implemented here.

        # fc_action at the real class width C; bf16 MXU, f32 accumulate.
        out = jnp.dot(h.astype(jnp.bfloat16), w2_ref[...],
                      preferred_element_type=jnp.float32)
        o_ref[...] = (out + b2_ref[...]).astype(o_ref.dtype)

    return kernel


def init_concat_head_params(key, feature_dim, modality, num_class,
                            dtype=jnp.float32):
    """Mirrors the PyTorch init: weights ~ N(0, 0.001), biases = 0.
    Weights are stored transposed vs. PyTorch, i.e. (in, out)."""
    std = 0.001
    d_in = len(modality) * feature_dim
    k1, k2 = jax.random.split(key)
    w1 = jax.random.normal(k1, (d_in, 512), dtype) * std
    b1 = jnp.zeros((512,), dtype)
    w2 = jax.random.normal(k2, (512, num_class), dtype) * std
    b2 = jnp.zeros((num_class,), dtype)
    return w1, b1, w2, b2


def prepare_concat_head_params(w1, b1, w2, b2, feature_dims):
    """One-time parameter prep (done at model load, not per call):
    split fc1 weight per modality (fused concat) and cast MXU operands to bf16.
    Biases stay f32; fc_action weight is kept at its real width C."""
    d_in, hidden = w1.shape
    num_class = w2.shape[1]
    assert sum(feature_dims) == d_in

    w1_parts, off = [], 0
    for f in feature_dims:
        w1_parts.append(w1[off:off + f, :].astype(jnp.bfloat16))
        off += f

    w2_p = w2.astype(jnp.bfloat16)                        # (H, C)
    b1_p = b1.reshape(1, hidden).astype(jnp.float32)       # (1, H)
    b2_p = b2.reshape(1, num_class).astype(jnp.float32)    # (1, C)

    return dict(w1_parts=tuple(w1_parts), b1=b1_p, w2=w2_p, b2=b2_p,
                num_class=num_class)


def concat_head_forward(inputs, params, *, block_b=DEFAULT_BLOCK_B):
    """inputs: list of (B, feature_dim_i) arrays, one per modality.
    If the upstream layer can hand over bf16 activations, pass them directly
    (the in-kernel cast becomes a no-op); do NOT cast in the wrapper."""
    n_mod = len(inputs)
    feature_dims = [int(x.shape[1]) for x in inputs]
    B = int(inputs[0].shape[0])

    w1_parts = params["w1_parts"]
    b1, w2, b2 = params["b1"], params["w2"], params["b2"]
    H = b1.shape[1]
    C = params["num_class"]

    # Batch tiling: weights DMA'd once and resident in VMEM (constant
    # index_map); x / out blocks stream and are double-buffered. No batch
    # padding -- Pallas clips the partial final block.
    tb = _choose_batch_tile(B, block_b)
    grid = (pl.cdiv(B, tb),)

    x_specs = [pl.BlockSpec((tb, f), lambda i: (i, 0)) for f in feature_dims]
    w1_specs = [pl.BlockSpec((f, H), lambda i: (0, 0)) for f in feature_dims]
    in_specs = x_specs + w1_specs + [
        pl.BlockSpec((1, H), lambda i: (0, 0)),    # b1
        pl.BlockSpec((H, C), lambda i: (0, 0)),    # w2
        pl.BlockSpec((1, C), lambda i: (0, 0)),    # b2
    ]
    out_spec = pl.BlockSpec((tb, C), lambda i: (i, 0))

    d_in = sum(feature_dims)
    x_bytes = sum(B * f * inputs[0].dtype.itemsize for f in feature_dims)
    w_bytes = d_in * H * 2 + H * 4 + H * C * 2 + C * 4
    o_bytes = B * C * 4
    cost = pl.CostEstimate(
        flops=2 * B * (d_in * H + H * C),
        transcendentals=0,
        bytes_accessed=x_bytes + w_bytes + o_bytes,
    )

    out = pl.pallas_call(
        _make_concat_head_kernel(n_mod),
        out_shape=jax.ShapeDtypeStruct((B, C), jnp.float32),
        grid=grid,
        in_specs=in_specs,
        out_specs=out_spec,
        compiler_params=pltpu.CompilerParams(
            # B-tiles are independent -> shard across TensorCores on v7x.
            dimension_semantics=("parallel",),
            # Sized budget: actual footprint at tb=4096 is ~3 MiB
            # (2*tb*(d_in+C)*4 for streamed blocks + tiny resident weights).
            vmem_limit_bytes=32 * 1024 * 1024,
        ),
        cost_estimate=cost,
    )(*inputs, *w1_parts, b1, w2, b2)

    return out


if __name__ == "__main__":
    # Module config (small, synthetic)
    feature_dim = 32
    modality = ["RGB", "Audio"]   # 2 modalities
    num_class = 16
    dropout = 0.5                 # identity at inference time
    batch = 24                    # exercises >=2 grid steps + a partial tile

    key = jax.random.PRNGKey(0)
    k_p, k_x1, k_x2 = jax.random.split(key, 3)

    # Deterministic init mirroring the PyTorch module, then one-time prep.
    w1, b1, w2, b2 = init_concat_head_params(k_p, feature_dim, modality, num_class)
    params = prepare_concat_head_params(w1, b1, w2, b2,
                                        [feature_dim] * len(modality))

    # Per-modality inputs
    x_rgb = jax.random.normal(k_x1, (batch, feature_dim), jnp.float32)
    x_aud = jax.random.normal(k_x2, (batch, feature_dim), jnp.float32)

    out = concat_head_forward([x_rgb, x_aud], params)
    out = jax.block_until_ready(out)

    # Plain-JAX f32 reference (eval-mode dropout = identity).
    x_cat = jnp.concatenate([x_rgb, x_aud], axis=1)
    ref = jnp.maximum(x_cat @ w1 + b1, 0.0) @ w2 + b2

    assert out.shape == (batch, num_class)
    # bf16 MXU operands (f32 accumulation): allow small relative error.
    assert jnp.allclose(out, ref, rtol=5e-2, atol=2e-5), (
        float(jnp.max(jnp.abs(out - ref))), float(jnp.max(jnp.abs(ref))))

    print("KERNEL_OK")
</pallas_src>

<mosaic_0001>
module attributes {stable_mosaic.version = 11 : i64} {
  func.func @kernel(%arg0: i32, %arg1: memref<16x32xf32, #tpu.memory_space<vmem>>, %arg2: memref<16x32xf32, #tpu.memory_space<vmem>>, %arg3: memref<32x512xbf16, #tpu.memory_space<vmem>>, %arg4: memref<32x512xbf16, #tpu.memory_space<vmem>>, %arg5: memref<1x512xf32, #tpu.memory_space<vmem>>, %arg6: memref<512x16xbf16, #tpu.memory_space<vmem>>, %arg7: memref<1x16xf32, #tpu.memory_space<vmem>>, %arg8: memref<16x16xf32, #tpu.memory_space<vmem>>) attributes {dimension_semantics = [#tpu.dimension_semantics<parallel>], iteration_bounds = array<i64: 2>, scalar_prefetch = 0 : i64, scratch_operands = 0 : i64, tpu.core_type = #tpu.core_type<tc>, window_params = [{transform_indices = @transform_0, window_bounds = array<i64: 16, 32>}, {transform_indices = @transform_1, window_bounds = array<i64: 16, 32>}, {pipeline_mode = #tpu.pipeline_mode<synchronous>, transform_indices = @transform_2, window_bounds = array<i64: 32, 512>}, {pipeline_mode = #tpu.pipeline_mode<synchronous>, transform_indices = @transform_3, window_bounds = array<i64: 32, 512>}, {pipeline_mode = #tpu.pipeline_mode<synchronous>, transform_indices = @transform_4, window_bounds = array<i64: 1, 512>}, {pipeline_mode = #tpu.pipeline_mode<synchronous>, transform_indices = @transform_5, window_bounds = array<i64: 512, 16>}, {pipeline_mode = #tpu.pipeline_mode<synchronous>, transform_indices = @transform_6, window_bounds = array<i64: 1, 16>}, {transform_indices = @transform_7, window_bounds = array<i64: 16, 16>}]} {
    %c0 = arith.constant 0 : index
    %c0_0 = arith.constant 0 : index
    %0 = vector.load %arg1[%c0, %c0_0] : memref<16x32xf32, #tpu.memory_space<vmem>>, vector<16x32xf32>
    %1 = arith.truncf %0 : vector<16x32xf32> to vector<16x32xbf16>
    %c0_1 = arith.constant 0 : index
    %c0_2 = arith.constant 0 : index
    %2 = vector.load %arg3[%c0_1, %c0_2] : memref<32x512xbf16, #tpu.memory_space<vmem>>, vector<32x512xbf16>
    %cst = arith.constant dense<0.000000e+00> : vector<16x512xf32>
    %3 = tpu.matmul %1, %2, %cst {dimension_numbers = #tpu.dot_dimension_numbers<[1], [0], [0], [1], [0, 0, 1, 1], [], []>} : vector<16x32xbf16>, vector<32x512xbf16>, vector<16x512xf32> -> vector<16x512xf32>
    %c0_3 = arith.constant 0 : index
    %c0_4 = arith.constant 0 : index
    %4 = vector.load %arg2[%c0_3, %c0_4] : memref<16x32xf32, #tpu.memory_space<vmem>>, vector<16x32xf32>
    %5 = arith.truncf %4 : vector<16x32xf32> to vector<16x32xbf16>
    %c0_5 = arith.constant 0 : index
    %c0_6 = arith.constant 0 : index
    %6 = vector.load %arg4[%c0_5, %c0_6] : memref<32x512xbf16, #tpu.memory_space<vmem>>, vector<32x512xbf16>
    %cst_7 = arith.constant dense<0.000000e+00> : vector<16x512xf32>
    %7 = tpu.matmul %5, %6, %cst_7 {dimension_numbers = #tpu.dot_dimension_numbers<[1], [0], [0], [1], [0, 0, 1, 1], [], []>} : vector<16x32xbf16>, vector<32x512xbf16>, vector<16x512xf32> -> vector<16x512xf32>
    %8 = arith.addf %3, %7 : vector<16x512xf32>
    %c0_8 = arith.constant 0 : index
    %c0_9 = arith.constant 0 : index
    %9 = vector.load %arg5[%c0_8, %c0_9] : memref<1x512xf32, #tpu.memory_space<vmem>>, vector<1x512xf32>
    %10 = vector.broadcast %9 : vector<1x512xf32> to vector<16x512xf32>
    %11 = arith.addf %8, %10 : vector<16x512xf32>
    %cst_10 = arith.constant 0.000000e+00 : f32
    %12 = vector.broadcast %cst_10 : f32 to vector<16x512xf32>
    %13 = arith.maximumf %11, %12 : vector<16x512xf32>
    %14 = arith.truncf %13 : vector<16x512xf32> to vector<16x512xbf16>
    %c0_11 = arith.constant 0 : index
    %c0_12 = arith.constant 0 : index
    %15 = vector.load %arg6[%c0_11, %c0_12] : memref<512x16xbf16, #tpu.memory_space<vmem>>, vector<512x16xbf16>
    %cst_13 = arith.constant dense<0.000000e+00> : vector<16x16xf32>
    %16 = tpu.matmul %14, %15, %cst_13 {dimension_numbers = #tpu.dot_dimension_numbers<[1], [0], [0], [1], [0, 0, 1, 1], [], []>} : vector<16x512xbf16>, vector<512x16xbf16>, vector<16x16xf32> -> vector<16x16xf32>
    %c0_14 = arith.constant 0 : index
    %c0_15 = arith.constant 0 : index
    %17 = vector.load %arg7[%c0_14, %c0_15] : memref<1x16xf32, #tpu.memory_space<vmem>>, vector<1x16xf32>
    %18 = vector.broadcast %17 : vector<1x16xf32> to vector<16x16xf32>
    %19 = arith.addf %16, %18 : vector<16x16xf32>
    %c0_16 = arith.constant 0 : index
    %c0_17 = arith.constant 0 : index
    %20 = vector.load %arg8[%c0_16, %c0_17] : memref<16x16xf32, #tpu.memory_space<vmem>>, vector<16x16xf32>
    tpu.vector_store %arg8[%c0_16, %c0_17], %19 {strides = array<i32>} : memref<16x16xf32, #tpu.memory_space<vmem>>, vector<16x16xf32>,
    return
  }
  func.func @transform_0(%arg0: i32) -> (i32, i32) {
    %c0_i32 = arith.constant 0 : i32
    %c0_i32_0 = arith.constant 0 : i32
    return %arg0, %c0_i32 : i32, i32
  }
  func.func @transform_1(%arg0: i32) -> (i32, i32) {
    %c0_i32 = arith.constant 0 : i32
    %c0_i32_0 = arith.constant 0 : i32
    return %arg0, %c0_i32 : i32, i32
  }
  func.func @transform_2(%arg0: i32) -> (i32, i32) {
    %c0_i32 = arith.constant 0 : i32
    %c0_i32_0 = arith.constant 0 : i32
    %c0_i32_1 = arith.constant 0 : i32
    return %c0_i32, %c0_i32_0 : i32, i32
  }
  func.func @transform_3(%arg0: i32) -> (i32, i32) {
    %c0_i32 = arith.constant 0 : i32
    %c0_i32_0 = arith.constant 0 : i32
    %c0_i32_1 = arith.constant 0 : i32
    return %c0_i32, %c0_i32_0 : i32, i32
  }
  func.func @transform_4(%arg0: i32) -> (i32, i32) {
    %c0_i32 = arith.constant 0 : i32
    %c0_i32_0 = arith.constant 0 : i32
    %c0_i32_1 = arith.constant 0 : i32
    return %c0_i32, %c0_i32_0 : i32, i32
  }
  func.func @transform_5(%arg0: i32) -> (i32, i32) {
    %c0_i32 = arith.constant 0 : i32
    %c0_i32_0 = arith.constant 0 : i32
    %c0_i32_1 = arith.constant 0 : i32
    return %c0_i32, %c0_i32_0 : i32, i32
  }
  func.func @transform_6(%arg0: i32) -> (i32, i32) {
    %c0_i32 = arith.constant 0 : i32
    %c0_i32_0 = arith.constant 0 : i32
    %c0_i32_1 = arith.constant 0 : i32
    return %c0_i32, %c0_i32_0 : i32, i32
  }
  func.func @transform_7(%arg0: i32) -> (i32, i32) {
    %c0_i32 = arith.constant 0 : i32
    %c0_i32_0 = arith.constant 0 : i32
    return %arg0, %c0_i32 : i32, i32
  }
}

</mosaic_0001>

<bundles_post_ra>
// kernel: tpu_custom_call.1
= control target key start
LH: loop header
LB: loop body
LE: loop exit
PB: predicated region body
PF: predicated region fallthrough
CT: control target
= control target key end

     0   :  { %s1653_s24 = smov 0   ;;  %s1655_s25 = smov 0   ;;  %s1893_s0 = inlined_call_operand.vmem [shape: f32[24,32], index: 0, kind: input, shape index: {}]   ;;  %s1894_s1 = inlined_call_operand.vmem [shape: f32[24,32], index: 1, kind: input, shape index: {}]   ;;  %s1895_s2 = inlined_call_operand.vmem [shape: bf16[32,512], index: 2, kind: input, shape index: {}]   ;;  %s1896_s3 = inlined_call_operand.vmem [shape: bf16[32,512], index: 3, kind: input, shape index: {}]   ;;  %s1897_s4 = inlined_call_operand.vmem [shape: f32[1,512], index: 4, kind: input, shape index: {}]   ;;  %s1898_s5 = inlined_call_operand.vmem [shape: bf16[512,16], index: 5, kind: input, shape index: {}]   ;;  %s1899_s6 = inlined_call_operand.vmem [shape: f32[1,16], index: 6, kind: input, shape index: {}]   ;;  %s1900_s7 = inlined_call_operand.vmem [shape: f32[24,16], index: 7, kind: output, shape index: {}]  }
   0x1   :  { %s1657_s26 = smov 0  }
   0x2 LB: > { %s1666_s27 = sadd.s32 4294967295, %s1578_s26   ;;  %s1668_s28 = sadd.s32 1, %s1578_s26   ;;  %s1578_s26 = sphi %s1657_s26, %s1904_s26   ;;  %s1574_s25 = sphi %s1655_s25, %s1903_s25   ;;  %s1570_s24 = sphi %s1653_s24, %s1902_s24  }
   0x3   : > { %s178_s29 = ssub.s32 %s1578_s26, %s1668_s28  ;;  %s181_s30 = sadd.s32 1, %s1574_s25 }
   0x4   : > { %p179_p0 = scmp.eq.s32.totalorder %s178_s29, 0  ;;  %p191_p1 = scmp.ne.s32.totalorder %s1574_s25, %s1570_s24 }
   0x5   : > { %p192_p2 = scmp.eq.s32.totalorder %s1666_s27, 1  ;;  %p1248_p3 = scmp.ge.s32.totalorder %s1578_s26, 1 }
   0x6   : > { %s1676_s8 = scalar_select %p179_p0, %s1574_s25, %s181_s30  }
   0x7   : > { %p1678_p4 = por %p192_p2, %p191_p1  ;;  %p265_p5 = scmp.lt.s32.totalorder %s1578_s26, 3 }
   0x9   : > { %p266_p6 = pnand %p1248_p3, %p265_p5 }
   0xa   : > { %v1468_v0 = vld [vmem:[%s1896_s3 + $0x4] ss:$16 sps:$4 sm:$0xff] (!%p266_p6)   ;;  %s1686_s12 = sshll.u32 (!%p266_p6), %s1666_s27, 1  ;;  %v1470_v1 = vld [vmem:[%s1896_s3 + $0xc] ss:$16 sps:$4 sm:$0xff] (!%p266_p6)   ;;  %v1612_v2 = vmov (!%p266_p6), 0   ;;  %v626_v55 = vlaneseq (!%p266_p6) }
   0xb   : > { %269 = sbr.rel (%p266_p6) target bundleno = 530 (0x212), region = 48  ;;  %441 = vmatprep.mubr.bf16.mxu0 (!%p266_p6), %v1612_v2  ;;  %484 = vmatprep.mubr.bf16.mxu1 (!%p266_p6), %v1612_v2  ;;  %p314_p7 = scmp.lt.s32.totalorder (!%p266_p6), %s1686_s12, 2  ;;  %v1472_v3 = vld [vmem:[%s1896_s3] ss:$16 sps:$4 sm:$0xff] (!%p266_p6)   ;;  %v1473_v4 = vld [vmem:[%s1896_s3 + $0x8] ss:$16 sps:$4 sm:$0xff] (!%p266_p6)  }
   0xc   : > { %409 = vmatprep.subr.bf16.mxu0 (!%p266_p6), %v1468_v0  ;;  %452 = vmatprep.subr.bf16.mxu1 (!%p266_p6), %v1470_v1  ;;  %v1474_v5 = vld [vmem:[%s1896_s3 + $0x24] ss:$16 sps:$4 sm:$0xff] (!%p266_p6)   ;;  %v1476_v6 = vld [vmem:[%s1896_s3 + $0x2c] ss:$16 sps:$4 sm:$0xff] (!%p266_p6)   ;;  %v1478_v7 = vld [vmem:[%s1896_s3 + $0x20] ss:$16 sps:$4 sm:$0xff] (!%p266_p6)  }
   0xd   : > { %410 = vmatpush1.bf16.msra.mxu0 (!%p266_p6), %v1472_v3  ;;  %453 = vmatpush1.bf16.msra.mxu1 (!%p266_p6), %v1473_v4  ;;  %v1479_v8 = vld [vmem:[%s1896_s3 + $0x28] ss:$16 sps:$4 sm:$0xff] (!%p266_p6)   ;;  %v1482_v9 = vld [vmem:[%s1895_s2 + $0x4] ss:$16 sps:$4 sm:$0xff] (!%p266_p6)   ;;  %v1480_v11 = vld [vmem:[%s1895_s2] ss:$16 sps:$4 sm:$0xff] (!%p266_p6)  }
   0xe   : > { %411 = vmatprep.subr.bf16.mxu0 (!%p266_p6), %v1474_v5  ;;  %454 = vmatprep.subr.bf16.mxu1 (!%p266_p6), %v1476_v6  ;;  %vm405_vm0 = vcmask (!%p266_p6), 261120   ;;  %v1483_v13 = vld [vmem:[%s1895_s2 + $0x8] ss:$16 sps:$4 sm:$0xff] (!%p266_p6)   ;;  %v1485_v15 = vld [vmem:[%s1895_s2 + $0xc] ss:$16 sps:$4 sm:$0xff] (!%p266_p6)   ;;  %v1492_v20 = vld [vmem:[%s1898_s5 + $0x40] sm:$0xff] (!%p266_p6)  }
   0xf   : > { %v1488_v16 = vld [vmem:[%s1895_s2 + $0x24] ss:$16 sps:$4 sm:$0xff] (!%p266_p6)   ;;  %v1486_v17 = vld [vmem:[%s1895_s2 + $0x20] ss:$16 sps:$4 sm:$0xff] (!%p266_p6)   ;;  %v1491_v18 = vld [vmem:[%s1895_s2 + $0x2c] ss:$16 sps:$4 sm:$0xff] (!%p266_p6)  }
  0x10   : > { %v1489_v19 = vld [vmem:[%s1895_s2 + $0x28] ss:$16 sps:$4 sm:$0xff] (!%p266_p6)   ;;  %v1493_v21 = vld [vmem:[%s1898_s5 + $0xc0] sm:$0xff] (!%p266_p6)   ;;  %v1500_v31 = vld [vmem:[%s1898_s5 + $0x50] sm:$0xff] (!%p266_p6)   ;;  %v627_v56 = vshrl.u32 (!%p266_p6), %v626_v55, 7  ;;  %s306_s22 = sand.u32 (!%p266_p6), 1, %s1570_s24  }
  0x11   : > { %412 = vmatpush1.bf16.msra.mxu0 (!%p266_p6), %v1478_v7  ;;  %455 = vmatpush1.bf16.msra.mxu1 (!%p266_p6), %v1479_v8  ;;  %v1494_v24 = vld [vmem:[%s1898_s5] sm:$0xff] (!%p266_p6)   ;;  %v1496_v27 = vld [vmem:[%s1898_s5 + $0x48] sm:$0xff] (!%p266_p6)   ;;  %v1501_v32 = vld [vmem:[%s1898_s5 + $0xd0] sm:$0xff] (!%p266_p6)   ;;  %s1249_s26 = sshll.u32 (!%p266_p6), %s306_s22, 4  ;;  %vm1011_vm1 = vcmask (!%p266_p6), 130048  }
  0x12   : > { %s315_s21 = scalar_select %p314_p7, %s1686_s12, 2  ;;  %538 = vmatprep.subr.bf16.mxu0 %v1482_v9  ;;  %581 = vmatprep.subr.bf16.mxu1 %v1485_v15  ;;  %v1495_v26 = vld [vmem:[%s1898_s5 + $0x80] sm:$0xff]   ;;  %v1497_v28 = vld [vmem:[%s1898_s5 + $0xc8] sm:$0xff]   ;;  %v1502_v33 = vld [vmem:[%s1898_s5 + $0x10] sm:$0xff]   ;;  %v628_v57 = vsub.s32 0, %v627_v56  ;;  %v636_v58 = vsub.s32 2, %v627_v56 }
  0x13   : > { %v1498_v29 = vld [vmem:[%s1898_s5 + $0x8] sm:$0xff]   ;;  %v1503_v34 = vld [vmem:[%s1898_s5 + $0x90] sm:$0xff]   ;;  %v1504_v35 = vld [vmem:[%s1898_s5 + $0x58] sm:$0xff]   ;;  %v632_v60 = vsub.s32 1, %v627_v56  ;;  %v640_v61 = vsub.s32 3, %v627_v56  ;;  %s1848_s24 = scalar_lea.vmem [#allocation2], %s1249_s26  }
  0x14   : > { %s1251_s11 = sshll.u32 %s315_s21, 3  ;;  %v1499_v30 = vld [vmem:[%s1898_s5 + $0x88] sm:$0xff]   ;;  %v1505_v36 = vld [vmem:[%s1898_s5 + $0xd8] sm:$0xff]   ;;  %v1508_v39 = vld [vmem:[%s1898_s5 + $0x60] sm:$0xff]   ;;  %s1022_s29 = ssub.s32 (%p1678_p4), 3, %s1686_s12 }
  0x15   : > { %s331_s15 = scalar_lea.vmem %s1894_s1, %s1251_s11  ;;  %s317_s17 = scalar_lea.vmem %s1893_s0, %s1251_s11  ;;  %v1506_v37 = vld [vmem:[%s1898_s5 + $0x18] sm:$0xff]   ;;  %v1509_v40 = vld [vmem:[%s1898_s5 + $0xe0] sm:$0xff]   ;;  %v1512_v43 = vld [vmem:[%s1898_s5 + $0x68] sm:$0xff]  }
  0x16   : > { %v354_v10 = vld [vmem:[%s331_s15] sm:$0xff]  ;;  %v355_v12 = vld [vmem:[%s331_s15 + $0x8] sm:$0xff]  ;;  %v1507_v38 = vld [vmem:[%s1898_s5 + $0x98] sm:$0xff]   ;;  %s1324_s30 = sshll.u32 (%p1678_p4), %s1666_s27, 4  ;;  %p1023_p8 = scmp.lt.s32.totalorder (%p1678_p4), %s1022_s29, 2 }
  0x17   : > { %v356_v14 = vpack.c.bf16 %v355_v12, %v354_v10  ;;  %v343_v22 = vld [vmem:[%s317_s17] sm:$0xff]  ;;  %v344_v23 = vld [vmem:[%s317_s17 + $0x8] sm:$0xff]  ;;  %v1516_v47 = vld [vmem:[%s1898_s5 + $0x70] sm:$0xff]   ;;  %s1859_s14 = scalar_lea.vmem (%p1678_p4), %s1900_s7, %s1324_s30  }
  0x18   : > { %v345_v25 = vpack.c.bf16 %v344_v23, %v343_v22  ;;  %v1510_v41 = vld [vmem:[%s1898_s5 + $0x20] sm:$0xff]   ;;  %v1513_v44 = vld [vmem:[%s1898_s5 + $0xe8] sm:$0xff]   ;;  %v1517_v48 = vld [vmem:[%s1898_s5 + $0xf0] sm:$0xff]  }
  0x19   : > { %1262 = vmatmul.mubr.msk.bf16.vlgmr.msra.gmra.mrb[0].mxu0 %vm405_vm0, %v356_v14  ;;  %1263 = vmatmul.mubr.msk.bf16.vlgmr.msra.gmra.mrb[0].mxu1 %vm405_vm0, %v356_v14  ;;  %v1511_v42 = vld [vmem:[%s1898_s5 + $0xa0] sm:$0xff]   ;;  %v1514_v45 = vld [vmem:[%s1898_s5 + $0x28] sm:$0xff]   ;;  %v1518_v49 = vld [vmem:[%s1898_s5 + $0x30] sm:$0xff]  }
  0x1a   : > { %539 = vmatpush1.bf16.msra.mxu0 %v1480_v11  ;;  %582 = vmatpush1.bf16.msra.mxu1 %v1483_v13  ;;  %v1515_v46 = vld [vmem:[%s1898_s5 + $0xa8] sm:$0xff]   ;;  %v1519_v50 = vld [vmem:[%s1898_s5 + $0xb0] sm:$0xff]   ;;  %v1520_v51 = vld [vmem:[%s1898_s5 + $0x78] sm:$0xff]  }
  0x1b   : > { %540 = vmatprep.subr.bf16.mxu0 %v1488_v16  ;;  %583 = vmatprep.subr.bf16.mxu1 %v1491_v18  ;;  %v1521_v52 = vld [vmem:[%s1898_s5 + $0xf8] sm:$0xff]   ;;  %v624_v59 = vld [vmem:[%s1897_s4] sm:$0xf] }
  0x1c   : > { %570 = vmatprep.mubr.bf16.mxu0 %v1612_v2  ;;  %613 = vmatprep.mubr.bf16.mxu1 %v1612_v2  ;;  %v1522_v53 = vld [vmem:[%s1898_s5 + $0x38] sm:$0xff]   ;;  %v629_v62 = vrot.slane %v624_v59, %v628_v57  ;;  %v637_v63 = vrot.slane %v624_v59, %v636_v58  ;;  %v633_v0 = vrot.slane %v624_v59, %v632_v60 }
  0x1d   : > { %v1523_v54 = vld [vmem:[%s1898_s5 + $0xb8] sm:$0xff]   ;;  %v641_v1 = vrot.slane %v624_v59, %v640_v61 }
  0x1e   : > { %541 = vmatpush1.bf16.msra.mxu0 %v1486_v17  ;;  %584 = vmatpush1.bf16.msra.mxu1 %v1489_v19 }
  0x1f   : > { %1327 = vmatprep.subr.bf16.mxu0 %v1492_v20  ;;  %1349 = vmatprep.subr.bf16.mxu1 %v1493_v21 }
  0x25   : > { %1272 = vmatmul.mubr.msk.bf16.vlgmr.msra.gmra.mrb[0].mxu0 %vm405_vm0, %v345_v25  ;;  %1273 = vmatmul.mubr.msk.bf16.vlgmr.msra.gmra.mrb[0].mxu1 %vm405_vm0, %v345_v25 }
  0x26   : > { %1328 = vmatpush3.bf16.msra.mxu0 %v1494_v24  ;;  %1350 = vmatpush3.bf16.msra.mxu1 %v1495_v26 }
  0x27   : > { %1329 = vmatprep.subr.bf16.mxu0 %v1496_v27  ;;  %1351 = vmatprep.subr.bf16.mxu1 %v1497_v28 }
  0x2a   : > { %1330 = vmatpush3.bf16.msra.mxu0 %v1498_v29  ;;  %1352 = vmatpush3.bf16.msra.mxu1 %v1499_v30 }
  0x2b   : > { %1331 = vmatprep.subr.bf16.mxu0 %v1500_v31  ;;  %1353 = vmatprep.subr.bf16.mxu1 %v1501_v32  ;;  %v1274_v32 = vld [vmem:[%s1899_s6] ss:$0 sm:$0xff] }
  0x2e   : > { %1332 = vmatpush3.bf16.msra.mxu0 %v1502_v33  ;;  %1354 = vmatpush3.bf16.msra.mxu1 %v1503_v34 }
  0x2f   : > { %1333 = vmatprep.subr.bf16.mxu0 %v1504_v35  ;;  %1355 = vmatprep.subr.bf16.mxu1 %v1505_v36 }
  0x32   : > { %1334 = vmatpush3.bf16.msra.mxu0 %v1506_v37  ;;  %1356 = vmatpush3.bf16.msra.mxu1 %v1507_v38 }
  0x33   : > { %1335 = vmatprep.subr.bf16.mxu0 %v1508_v39  ;;  %1357 = vmatprep.subr.bf16.mxu1 %v1509_v40 }
  0x36   : > { %1336 = vmatpush3.bf16.msra.mxu0 %v1510_v41  ;;  %1358 = vmatpush3.bf16.msra.mxu1 %v1511_v42 }
  0x37   : > { %1337 = vmatprep.subr.bf16.mxu0 %v1512_v43  ;;  %1359 = vmatprep.subr.bf16.mxu1 %v1513_v44 }
  0x3a   : > { %1338 = vmatpush3.bf16.msra.mxu0 %v1514_v45  ;;  %1360 = vmatpush3.bf16.msra.mxu1 %v1515_v46 }
  0x3b   : > { %1339 = vmatprep.subr.bf16.mxu0 %v1516_v47  ;;  %1361 = vmatprep.subr.bf16.mxu1 %v1517_v48 }
  0x3e   : > { %1340 = vmatpush3.bf16.msra.mxu0 %v1518_v49  ;;  %1362 = vmatpush3.bf16.msra.mxu1 %v1519_v50 }
  0x3f   : > { %1341 = vmatprep.subr.bf16.mxu0 %v1520_v51  ;;  %1363 = vmatprep.subr.bf16.mxu1 %v1521_v52 }
  0x42   : > { %1342 = vmatpush3.bf16.msra.mxu0 %v1522_v53  ;;  %1364 = vmatpush3.bf16.msra.mxu1 %v1523_v54 }
  0xf8   : > { %v572_v2 = vpop.f32.mrb[0].mxu0  ;;  %v615_v3 = vpop.f32.mrb[0].mxu1 }
  0xf9   : > { %v646_v4 = vadd.f32 %v629_v62, %v572_v2  ;;  %v648_v5 = vadd.f32 %v637_v63, %v615_v3  ;;  %v574_v6 = vpop.f32.mrb[1].mxu0  ;;  %v617_v7 = vpop.f32.mrb[1].mxu1 }
  0xfa   : > { %v647_v8 = vadd.f32 %v633_v0, %v574_v6  ;;  %v649_v9 = vadd.f32 %v641_v1, %v617_v7  ;;  %v576_v10 = vpop.f32.mrb[2].mxu0  ;;  %v619_v11 = vpop.f32.mrb[2].mxu1 }
  0xfb   : > { %v650_v12 = vadd.f32 %v629_v62, %v576_v10  ;;  %v652_v13 = vadd.f32 %v637_v63, %v619_v11  ;;  %v578_v14 = vpop.f32.mrb[3].mxu0  ;;  %v621_v15 = vpop.f32.mrb[3].mxu1  ;;  %v654_v18 = vmax.f32 %v646_v4, 0.0  ;;  %v656_v19 = vmax.f32 %v648_v5, 0.0 }
  0xfc   : > { %v651_v16 = vadd.f32 %v633_v0, %v578_v14  ;;  %v653_v17 = vadd.f32 %v641_v1, %v621_v15  ;;  %v655_v22 = vmax.f32 %v647_v8, 0.0  ;;  %v657_v23 = vmax.f32 %v649_v9, 0.0 }
  0xfd   : > { %v658_v20 = vmax.f32 %v650_v12, 0.0  ;;  %v660_v21 = vmax.f32 %v652_v13, 0.0 }
  0xfe   : > { %v659_v24 = vmax.f32 %v651_v16, 0.0  ;;  %v661_v25 = vmax.f32 %v653_v17, 0.0 }
  0xff   : > { %v662_v26 = vpack.c.bf16 %v658_v20, %v654_v18  ;;  %v664_v27 = vpack.c.bf16 %v660_v21, %v656_v19 }
 0x100   : > { %v663_v28 = vpack.c.bf16 %v659_v24, %v655_v22  ;;  %v665_v29 = vpack.c.bf16 %v661_v25, %v657_v23 }
 0x102   : > { %961 = vmatprep.mubr.bf16.mxu0 %v663_v28  ;;  %1002 = vmatprep.mubr.bf16.mxu1 %v665_v29 }
 0x103   : > { %962 = vmatmul.mubr.bf16.vlgmr.msra.gmra.mrb[4].mxu0 %v662_v26  ;;  %1003 = vmatmul.mubr.bf16.vlgmr.msra.gmra.mrb[4].mxu1 %v664_v27 }
 0x1d6   : > { %v1343_v30 = vpop.f32.mrb[4].mxu0  ;;  %v1365_v31 = vpop.f32.mrb[4].mxu1 }
 0x1d7   : > { %v1344_v33 = vpop.f32.mrb[5].mxu0  ;;  %v1366_v34 = vpop.f32.mrb[5].mxu1 }
 0x1d8   : > { %v1345_v35 = vadd.f32 %v1344_v33, %v1343_v30  ;;  %v1367_v36 = vadd.f32 %v1366_v34, %v1365_v31  ;;  %v1346_v37 = vpop.f32.mrb[6].mxu0  ;;  %v1368_v38 = vpop.f32.mrb[6].mxu1 }
 0x1d9   : > { %v1347_v39 = vpop.f32.mrb[7].mxu0  ;;  %v1369_v40 = vpop.f32.mrb[7].mxu1 }
 0x1da   : > { %v964_v41 = vadd.f32 %v1345_v35, %v1274_v32  ;;  %v1348_v42 = vadd.f32 %v1347_v39, %v1346_v37  ;;  %v1370_v43 = vadd.f32 %v1369_v40, %v1368_v38  ;;  %1020 = sbr.rel (!%p1678_p4) target bundleno = 530 (0x212), region = 52 }
 0x1dc   : > { %v1005_v44 = vadd.f32 %v1367_v36, %v964_v41  ;;  %v967_v45 = vadd.f32 %v1348_v42, %v1274_v32 }
 0x1de   : > { %1012 = vst.msk [vmem:[%s1848_s24] sm:$0xff] %vm1011_vm1, %v1005_v44  ;;  %v1008_v46 = vadd.f32 %v1370_v43, %v967_v45 }
 0x1e0   : > { %1013 = vst.msk [vmem:[%s1848_s24 + $0x8] sm:$0xff] %vm1011_vm1, %v1008_v46 }
 0x1e1   : > { %s1906_s29 = smov (!%p1023_p8, %s1022_s29), 2 }
 0x1e2   : > { %s1309_s15 = sshll.u32 %s1906_s29, 7 }
 0x1e3   : > { %p1312_p9 = scmp.eq.s32.totalorder %s1309_s15, 0 }
 0x1e4   : > { %s1865_s16 = sshrl.u32 (!%p1312_p9), %s1906_s29, 1 }
 0x1e5   : > { %1031 = sbr.rel (%p1312_p9) target bundleno = 530 (0x212), region = 56  ;;  %p1313_p10 = scmp.le.s32.totalorder (!%p1312_p9), %s1865_s16, 0 }
 0x1ec   : > { %1195 = sbr.rel (%p1313_p10) target bundleno = 509 (0x1fd), region = 135  ;;  %s1580_s27 = smov (!%p1313_p10), %s1859_s14  }
 0x1ed   : > { %s1584_s9 = smov (!%p1313_p10), %s1848_s24   ;;  %s1588_s12 = smov (!%p1313_p10), 0  }
 0x1ee   : > { %s1592_s17 = smov (!%p1313_p10), 0  }
 0x1f3 LB: >> { %v1095_v47 = vld [vmem:[%s1586_s9] sm:$0xff]  ;;  %v1097_v48 = vld [vmem:[%s1586_s9 + $0x8] sm:$0xff]  ;;  %s1099_s18 = sadd.s32 1, %s1590_s12  ;;  %s1089_s17 = sadd.s32 1, %s1594_s17   ;;  %s1594_s17 = sphi %s1592_s17, %s1089_s17   ;;  %s1590_s12 = sphi %s1588_s12, %s1589_s12   ;;  %s1586_s9 = sphi %s1584_s9, %s1104_s9   ;;  %s1582_s27 = sphi %s1580_s27, %s1105_s27  }
 0x1f4   : >> { %1096 = vst [vmem:[%s1582_s27] sm:$0xff] %v1095_v47  ;;  %1098 = vst [vmem:[%s1582_s27 + $0x8] sm:$0xff] %v1097_v48  ;;  %p1100_p11 = scmp.ge.s32.totalorder %s1099_s18, %s1865_s16  ;;  %p1088_p12 = scmp.ge.s32.totalorder %s1089_s17, %s1865_s16 }
 0x1f6   : >> { %s1908_s18 = smov (%p1100_p11, %s1099_s18), 0  ;;  %1091 = sbr.rel (!%p1088_p12) target bundleno = 499 (0x1f3), region = 141 }
 0x1f7   : >> { %s1314_s19 = sshll.u32 %s1908_s18, 4  ;;  %s1589_s12 = smov %s1908_s18  }
 0x1f8   : >> { %s1104_s9 = scalar_lea.vmem %s1848_s24, %s1314_s19 [#allocation2]   ;;  %s1105_s27 = scalar_lea.vmem %s1859_s14, %s1314_s19  }
 0x1fd PF: > { %s1875_s20 = sand.u32 1, %s1906_s29   ;;  %s1325_s21 = sshll.u32 %s1865_s16, 4 }
 0x1fe   : > { %s1110_s22 = scalar_lea.vmem %s1848_s24, %s1325_s21 [#allocation2]   ;;  %s1112_s23 = scalar_lea.vmem %s1859_s14, %s1325_s21  }
 0x1ff   : > { %p1319_p13 = scmp.le.s32.totalorder %s1875_s20, 0 }
 0x200   : > { %s1596_s11 = smov (!%p1319_p13), %s1112_s23   ;;  %s1600_s26 = smov (!%p1319_p13), %s1110_s22  }
 0x201   : > { %1209 = sbr.rel (%p1319_p13) target bundleno = 530 (0x212), region = 146  ;;  %s1604_s30 = smov (!%p1319_p13), 0  }
 0x202   : > { %s1608_s10 = smov (!%p1319_p13), 0  }
 0x208 LB: >> { %v1122_v49 = vld [vmem:[%s1602_s26] sm:$0xff]  ;;  %s1124_s29 = sadd.s32 1, %s1606_s30  ;;  %s1116_s10 = sadd.s32 1, %s1610_s10   ;;  %s1610_s10 = sphi %s1608_s10, %s1116_s10   ;;  %s1606_s30 = sphi %s1604_s30, %s1605_s30   ;;  %s1602_s26 = sphi %s1600_s26, %s1129_s26   ;;  %s1598_s11 = sphi %s1596_s11, %s1130_s11  }
 0x209   : >> { %1123 = vst [vmem:[%s1598_s11] sm:$0xff] %v1122_v49  ;;  %p1125_p0 = scmp.ge.s32.totalorder %s1124_s29, %s1875_s20  ;;  %p1115_p1 = scmp.ge.s32.totalorder %s1116_s10, %s1875_s20 }
 0x20b   : >> { %s1910_s29 = smov (%p1125_p0, %s1124_s29), 0  ;;  %1118 = sbr.rel (!%p1115_p1) target bundleno = 520 (0x208), region = 152 }
 0x20c   : >> { %s1320_s24 = sshll.u32 %s1910_s29, 3  ;;  %s1605_s30 = smov %s1910_s29  }
 0x20d   : >> { %s1129_s26 = scalar_lea.vmem %s1110_s22, %s1320_s24 [#allocation2]   ;;  %s1130_s11 = scalar_lea.vmem %s1112_s23, %s1320_s24  }
 0x212 PF: > { %p14_p2 = scmp.ge.s32.totalorder %s1668_s28, 4   ;;  %s1902_s24 = smov %s1574_s25 }
 0x213   : > { %s1903_s25 = smov %s1676_s8  ;;  %s1904_s26 = smov %s1668_s28 }
 0x214   :  { %16 = sbr.rel (!%p14_p2) target bundleno = 2 (0x2), region = 163 }

</bundles_post_ra>
